<compile_context>
chip_gen: v5e
topology: v5e:2x2
jax: 0.10.0
libtpu: 0.0.40
codegen_flags: <defaults>
</compile_context>

<pallas_src>
import jax
import jax.numpy as jnp
from jax.experimental import pallas as pl
from jax.experimental.pallas import tpu as pltpu

BN_EPS = 1e-5
KSIZE = 4


# ----------------------------- Pallas kernels --------------------------------

def _make_conv_bn_relu_kernel(parities: int, cout: int):
    """(parities*cout, Kd) @ (Kd, M) matmul fused with batch-stat BN + ReLU.

    BN stats are one pass (sum & sum-of-squares over the lane axis), then grouped
    across the `parities` row-blocks so they are true per-channel statistics over
    all N*OH*OW output positions.
    """
    def kernel(w_ref, p_ref, o_ref):
        # bf16 (or f32) operands, f32 accumulation on the MXU; epilogue stays f32.
        y = jnp.dot(w_ref[...], p_ref[...], preferred_element_type=jnp.float32)
        cnt = float(parities * y.shape[1])               # = N * OH * OW
        s = jnp.sum(y, axis=1, keepdims=True)            # (parities*cout, 1)
        ss = jnp.sum(y * y, axis=1, keepdims=True)
        s_g, ss_g = s[0:cout, :], ss[0:cout, :]
        for p in range(1, parities):                     # static python loop (parities = 1 or 4)
            s_g = s_g + s[p * cout:(p + 1) * cout, :]
            ss_g = ss_g + ss[p * cout:(p + 1) * cout, :]
        mean = s_g / cnt
        var = jnp.maximum(ss_g / cnt - mean * mean, 0.0)  # biased var (PyTorch BN forward)
        inv = jax.lax.rsqrt(var + BN_EPS)                 # gamma=1, beta=0 (default init)
        if parities > 1:                                  # broadcast per-channel stats back to rows
            mean = jnp.concatenate([mean] * parities, axis=0)
            inv = jnp.concatenate([inv] * parities, axis=0)
        o_ref[...] = jnp.maximum((y - mean) * inv, 0.0)
    return kernel


def _conv_bias_tanh_kernel(w_ref, p_ref, b_ref, o_ref):
    y = jnp.dot(w_ref[...], p_ref[...], preferred_element_type=jnp.float32)
    o_ref[...] = jnp.tanh(y + b_ref[...])


def _layer_pallas(wmat, patches, bias_rows, parities, cout, final):
    rows, kd = wmat.shape
    _, m = patches.shape
    if final:
        kernel = _conv_bias_tanh_kernel
        in_specs = [pl.BlockSpec((rows, kd), lambda i: (0, 0)),
                    pl.BlockSpec((kd, m), lambda i: (0, 0)),
                    pl.BlockSpec((rows, 1), lambda i: (0, 0))]
        args = (wmat, patches, bias_rows)
    else:
        kernel = _make_conv_bn_relu_kernel(parities, cout)
        in_specs = [pl.BlockSpec((rows, kd), lambda i: (0, 0)),
                    pl.BlockSpec((kd, m), lambda i: (0, 0))]
        args = (wmat, patches)
    return pl.pallas_call(
        kernel,
        grid=(1,),
        in_specs=in_specs,
        out_specs=pl.BlockSpec((rows, m), lambda i: (0, 0)),
        out_shape=jax.ShapeDtypeStruct((rows, m), jnp.float32),
        compiler_params=pltpu.CompilerParams(dimension_semantics=("arbitrary",)),
    )(*args)


# ------------------------------- JAX glue -------------------------------------

def _im2col_cfirst(xp, win, oh, ow):
    # xp: (C, N, Hp, Wp) -> (win*win*C, N*oh*ow); row index = (th*win + tw)*C + ci.
    c, n = xp.shape[0], xp.shape[1]
    taps = [xp[:, :, i:i + oh, j:j + ow] for i in range(win) for j in range(win)]
    return jnp.stack(taps, axis=0).reshape(win * win * c, n * oh * ow)


def _gen_block(x, layer, use_pallas):
    # x: (Cin, N, H, W) channel-major activation (float32).
    wmat, bias_rows = layer["wmat"], layer["bias"]
    stride, final, par, cout = layer["stride"], layer["final"], layer["par"], layer["cout"]
    _, n, h, w = x.shape
    xc = x.astype(wmat.dtype)                      # bf16 MXU operands (f32 accumulation in-kernel)
    if stride == 1:
        pad, win = KSIZE - 1, KSIZE                # flipped-kernel VALID conv
    else:
        pad, win = 1, 2                            # sub-pixel decomposition: 2x2 conv per parity
    xp = jnp.pad(xc, ((0, 0), (0, 0), (pad, pad), (pad, pad)))
    oh = h + 2 * pad - win + 1
    ow = w + 2 * pad - win + 1
    patches = _im2col_cfirst(xp, win, oh, ow)      # (win*win*Cin, N*oh*ow)

    if use_pallas:
        y = _layer_pallas(wmat, patches, bias_rows, par, cout, final)
    else:
        # plain-jnp reference of the identical restructured math (same dtype casts)
        yf = jnp.dot(wmat.astype(jnp.float32), patches.astype(jnp.float32))
        if final:
            y = jnp.tanh(yf + bias_rows)
        else:
            yg = yf.reshape(par, cout, -1)
            mean = jnp.mean(yg, axis=(0, 2), keepdims=True)
            var = jnp.mean((yg - mean) ** 2, axis=(0, 2), keepdims=True)
            y = jnp.maximum((yg - mean) * jax.lax.rsqrt(var + BN_EPS), 0.0)
            y = y.reshape(par * cout, -1)

    if stride == 1:
        return y.reshape(cout, n, oh, ow)
    # pixel-shuffle: interleave the 4 parity outputs -> (Cout, N, 2*oh, 2*ow)
    y = y.reshape(2, 2, cout, n, oh, ow)           # (ph, pw, co, n, mh, mw)
    y = y.transpose(2, 3, 4, 0, 5, 1)              # (co, n, mh, ph, mw, pw)
    return y.reshape(cout, n, 2 * oh, 2 * ow)


def follower_generator(noise, prepped, z_dim, use_pallas=True):
    # noise: (N, z_dim).  PyTorch views it as (N, z_dim, 1, 1); we keep channel-major.
    n = noise.shape[0]
    x = noise.T.reshape(z_dim, n, 1, 1).astype(jnp.float32)
    for layer in prepped:
        x = _gen_block(x, layer, use_pallas)
    return x.transpose(1, 0, 2, 3)                 # NCHW: (N, im_chan, 52, 52)


# ---------------------------- parameters --------------------------------------

def init_raw_params(key, z_dim=10, im_chan=1, hidden_dim=8):
    # (cin, cout, stride, final_layer) exactly mirroring FollowerGenerator.__init__
    cfg = [
        (z_dim,          hidden_dim * 8, 1, False),
        (hidden_dim * 8, hidden_dim * 4, 2, False),
        (hidden_dim * 4, hidden_dim * 2, 2, False),
        (hidden_dim * 2, hidden_dim,     1, False),
        (hidden_dim,     im_chan,        2, True),
    ]
    params = []
    for (cin, cout, stride, final) in cfg:
        key, kw, kb = jax.random.split(key, 3)
        bound = 1.0 / float(jnp.sqrt(cin * KSIZE * KSIZE))
        w = jax.random.uniform(kw, (cin, cout, KSIZE, KSIZE), jnp.float32, -bound, bound)
        b = jax.random.uniform(kb, (cout,), jnp.float32, -bound, bound)
        params.append((w, b, stride, final))
    return params


def prep_params(raw_params, compute_dtype=jnp.bfloat16):
    """One-time (hoisted) packing of PyTorch ConvTranspose2d weights into matmul-ready layout."""
    prepped = []
    for (w, b, stride, final) in raw_params:
        cin, cout, k, _ = w.shape
        if stride == 1:
            # rows = co ; cols = (kh*k + kw)*cin + ci of the spatially flipped kernel
            wf = jnp.flip(w, axis=(2, 3))
            wmat = wf.transpose(1, 2, 3, 0).reshape(cout, k * k * cin)
            par = 1
        else:
            # stride 2, k=4: pack the 4 output-parity sub-kernels into the row dim.
            # rows = (ph*2+pw)*cout + co ; cols = (th*2+tw)*cin + ci
            # value = w[ci, co, ph + 2*(1-th), pw + 2*(1-tw)]
            assert stride == 2 and k == 4
            wr = w.reshape(cin, cout, 2, 2, 2, 2)      # (ci, co, kh2, khp, kw2, kwp)
            a = wr.transpose(3, 5, 1, 2, 4, 0)         # (ph, pw, co, kh2, kw2, ci)
            a = jnp.flip(a, axis=(3, 4))               # kh2 -> th = 1 - kh2 (same for kw)
            wmat = a.reshape(4 * cout, 4 * cin)
            par = 4
        bias_rows = None
        if final:  # bias dropped for BN layers: BN(y + b) == BN(y) when gamma=1, beta=0
            bias_rows = jnp.tile(b.reshape(1, cout), (par, 1)).reshape(par * cout, 1)
            bias_rows = bias_rows.astype(jnp.float32)
        prepped.append(dict(wmat=wmat.astype(compute_dtype), bias=bias_rows,
                            stride=stride, final=final, par=par, cout=cout))
    return prepped


# ------------------- independent f32 reference (dilate + pad) -----------------

def _naive_reference(noise, raw_params, z_dim):
    """Textbook zero-insert + pad + flipped-kernel im2col formulation in f32 (NHWC),
    independent of the sub-pixel / packed-weight restructuring used above."""
    n = noise.shape[0]
    x = noise.reshape(n, z_dim, 1, 1).transpose(0, 2, 3, 1)
    for (w, b, stride, final) in raw_params:
        cin, cout, k, _ = w.shape
        nb, h, ww, _ = x.shape
        if stride > 1:
            dh, dw = (h - 1) * stride + 1, (ww - 1) * stride + 1
            xd = jnp.zeros((nb, dh, dw, cin), x.dtype).at[:, ::stride, ::stride, :].set(x)
        else:
            xd = x
        p = k - 1
        xp = jnp.pad(xd, ((0, 0), (p, p), (p, p), (0, 0)))
        oh, ow = xp.shape[1] - k + 1, xp.shape[2] - k + 1
        taps = [xp[:, i:i + oh, j:j + ow, :] for i in range(k) for j in range(k)]
        patches = jnp.stack(taps, axis=3).reshape(nb * oh * ow, k * k * cin)
        wmat = jnp.flip(w, axis=(2, 3)).transpose(2, 3, 0, 1).reshape(k * k * cin, cout)
        y = jnp.dot(patches, wmat, precision=jax.lax.Precision.HIGHEST) + b.reshape(1, cout)
        if final:
            y = jnp.tanh(y)
        else:
            mean = jnp.mean(y, axis=0, keepdims=True)
            var = jnp.mean((y - mean) ** 2, axis=0, keepdims=True)
            y = jnp.maximum((y - mean) * jax.lax.rsqrt(var + BN_EPS), 0.0)
        x = y.reshape(nb, oh, ow, cout)
    return x.transpose(0, 3, 1, 2)


# --------------------------------- main ----------------------------------------

if __name__ == "__main__":
    key = jax.random.PRNGKey(0)
    kp, kn = jax.random.split(key)

    z_dim, im_chan, hidden_dim, batch = 10, 1, 8, 2   # small but shape-consistent config
    raw = init_raw_params(kp, z_dim, im_chan, hidden_dim)
    noise = jax.random.normal(kn, (batch, z_dim), jnp.float32)

    # Production path: bf16 MXU operands, f32 accumulation, f32 epilogue.
    params_bf16 = prep_params(raw, jnp.bfloat16)
    out = jax.block_until_ready(follower_generator(noise, params_bf16, z_dim, use_pallas=True))
    assert out.shape == (batch, im_chan, 52, 52), out.shape

    # Check 1: Pallas kernels vs the identical restructured math in plain jnp (same bf16 casts).
    ref = jax.block_until_ready(follower_generator(noise, params_bf16, z_dim, use_pallas=False))
    err1 = float(jnp.max(jnp.abs(out - ref)))
    assert jnp.allclose(out, ref, atol=1e-2, rtol=1e-2), err1

    # Check 2: full-f32 Pallas path vs an independent dilate+pad im2col reference
    # (validates the sub-pixel decomposition / packed-weight restructuring itself).
    params_f32 = prep_params(raw, jnp.float32)
    out_f32 = jax.block_until_ready(follower_generator(noise, params_f32, z_dim, use_pallas=True))
    naive = jax.block_until_ready(_naive_reference(noise, raw, z_dim))
    err2 = float(jnp.max(jnp.abs(out_f32 - naive)))
    assert jnp.allclose(out_f32, naive, atol=2e-2, rtol=2e-2), err2

    print("KERNEL_OK")
</pallas_src>

<mosaic_0001>
module attributes {stable_mosaic.version = 11 : i64} {
  func.func @kernel(%arg0: i32, %arg1: memref<64x160xbf16, #tpu.memory_space<vmem>>, %arg2: memref<160x32xbf16, #tpu.memory_space<vmem>>, %arg3: memref<64x32xf32, #tpu.memory_space<vmem>>) attributes {dimension_semantics = [#tpu.dimension_semantics<arbitrary>], iteration_bounds = array<i64: 1>, scalar_prefetch = 0 : i64, scratch_operands = 0 : i64, tpu.core_type = #tpu.core_type<tc>, window_params = [{pipeline_mode = #tpu.pipeline_mode<synchronous>, transform_indices = @transform_0, window_bounds = array<i64: 64, 160>}, {pipeline_mode = #tpu.pipeline_mode<synchronous>, transform_indices = @transform_1, window_bounds = array<i64: 160, 32>}, {pipeline_mode = #tpu.pipeline_mode<synchronous>, transform_indices = @transform_2, window_bounds = array<i64: 64, 32>}]} {
    %c0 = arith.constant 0 : index
    %c0_0 = arith.constant 0 : index
    %0 = vector.load %arg1[%c0, %c0_0] : memref<64x160xbf16, #tpu.memory_space<vmem>>, vector<64x160xbf16>
    %c0_1 = arith.constant 0 : index
    %c0_2 = arith.constant 0 : index
    %1 = vector.load %arg2[%c0_1, %c0_2] : memref<160x32xbf16, #tpu.memory_space<vmem>>, vector<160x32xbf16>
    %cst = arith.constant dense<0.000000e+00> : vector<64x32xf32>
    %2 = tpu.matmul %0, %1, %cst {dimension_numbers = #tpu.dot_dimension_numbers<[1], [0], [0], [1], [0, 0, 1, 1], [], []>} : vector<64x160xbf16>, vector<160x32xbf16>, vector<64x32xf32> -> vector<64x32xf32>
    %cst_3 = arith.constant dense<0.000000e+00> : vector<64xf32>
    %3 = vector.multi_reduction <add>, %2, %cst_3 [1] : vector<64x32xf32> to vector<64xf32>
    %4 = vector.shape_cast %3 : vector<64xf32> to vector<64x1xf32>
    %5 = arith.mulf %2, %2 : vector<64x32xf32>
    %cst_4 = arith.constant dense<0.000000e+00> : vector<64xf32>
    %6 = vector.multi_reduction <add>, %5, %cst_4 [1] : vector<64x32xf32> to vector<64xf32>
    %7 = vector.shape_cast %6 : vector<64xf32> to vector<64x1xf32>
    %cst_5 = arith.constant 3.200000e+01 : f32
    %8 = vector.broadcast %cst_5 : f32 to vector<64x1xf32>
    %9 = arith.divf %4, %8 : vector<64x1xf32>
    %cst_6 = arith.constant 3.200000e+01 : f32
    %10 = vector.broadcast %cst_6 : f32 to vector<64x1xf32>
    %11 = arith.divf %7, %10 : vector<64x1xf32>
    %12 = arith.mulf %9, %9 : vector<64x1xf32>
    %13 = arith.subf %11, %12 : vector<64x1xf32>
    %cst_7 = arith.constant 0.000000e+00 : f32
    %14 = vector.broadcast %cst_7 : f32 to vector<64x1xf32>
    %15 = arith.maximumf %13, %14 : vector<64x1xf32>
    %cst_8 = arith.constant 9.99999974E-6 : f32
    %16 = vector.broadcast %cst_8 : f32 to vector<64x1xf32>
    %17 = arith.addf %15, %16 : vector<64x1xf32>
    %18 = math.rsqrt %17 : vector<64x1xf32>
    %19 = vector.broadcast %9 : vector<64x1xf32> to vector<64x32xf32>
    %20 = arith.subf %2, %19 : vector<64x32xf32>
    %21 = vector.broadcast %18 : vector<64x1xf32> to vector<64x32xf32>
    %22 = arith.mulf %20, %21 : vector<64x32xf32>
    %cst_9 = arith.constant 0.000000e+00 : f32
    %23 = vector.broadcast %cst_9 : f32 to vector<64x32xf32>
    %24 = arith.maximumf %22, %23 : vector<64x32xf32>
    %c0_10 = arith.constant 0 : index
    %c0_11 = arith.constant 0 : index
    %25 = vector.load %arg3[%c0_10, %c0_11] : memref<64x32xf32, #tpu.memory_space<vmem>>, vector<64x32xf32>
    tpu.vector_store %arg3[%c0_10, %c0_11], %24 {strides = array<i32>} : memref<64x32xf32, #tpu.memory_space<vmem>>, vector<64x32xf32>,
    return
  }
  func.func @transform_0(%arg0: i32) -> (i32, i32) {
    %c0_i32 = arith.constant 0 : i32
    %c0_i32_0 = arith.constant 0 : i32
    %c0_i32_1 = arith.constant 0 : i32
    return %c0_i32, %c0_i32_0 : i32, i32
  }
  func.func @transform_1(%arg0: i32) -> (i32, i32) {
    %c0_i32 = arith.constant 0 : i32
    %c0_i32_0 = arith.constant 0 : i32
    %c0_i32_1 = arith.constant 0 : i32
    return %c0_i32, %c0_i32_0 : i32, i32
  }
  func.func @transform_2(%arg0: i32) -> (i32, i32) {
    %c0_i32 = arith.constant 0 : i32
    %c0_i32_0 = arith.constant 0 : i32
    %c0_i32_1 = arith.constant 0 : i32
    return %c0_i32, %c0_i32_0 : i32, i32
  }
}

</mosaic_0001>

<bundles_post_ra>
// kernel: tpu_custom_call.1
= control target key start
LH: loop header
LB: loop body
LE: loop exit
PB: predicated region body
PF: predicated region fallthrough
CT: control target
= control target key end

     0   :  { %vm136_vm0 = vcmask 261120   ;;  %s822_s1 = inlined_call_operand.vmem [shape: bf16[160,32], index: 1, kind: input, shape index: {}]   ;;  %s823_s0 = inlined_call_operand.vmem [shape: bf16[64,160], index: 0, kind: input, shape index: {}]   ;;  %s824_s2 = inlined_call_operand.vmem [shape: f32[64,32], index: 2, kind: output, shape index: {}]  }
   0x1   :  { %v525_v0 = vld [vmem:[%s822_s1 + $0x38] sm:$0xff]  ;;  %v527_v1 = vld [vmem:[%s822_s1 + $0x48] sm:$0xff]  ;;  %v524_v2 = vld [vmem:[%s822_s1 + $0x30] sm:$0xff] }
   0x2   :  { %149 = vmatpush.bf16.msra.mxu0 %v525_v0  ;;  %528 = vmatpush.bf16.msra.mxu2 %v525_v0  ;;  %v526_v3 = vld [vmem:[%s822_s1 + $0x40] sm:$0xff]  ;;  %v512_v4 = vld [vmem:[%s823_s0 + $0x14] sm:$0xf]  ;;  %v446_v5 = vld [vmem:[%s823_s0 + $0x18] sm:$0xf0] }
   0x3   :  { %536 = vmatpush.bf16.msra.mxu3 %v527_v1  ;;  %184 = vmatpush.bf16.msra.mxu1 %v527_v1  ;;  %v510_v6 = vld [vmem:[%s823_s0 + $0x4] sm:$0xf]  ;;  %v438_v7 = vld [vmem:[%s823_s0 + $0x8] sm:$0xf0]  ;;  %v449_v9 = vor.u32 %v512_v4, %v446_v5  ;;  %v521_v12 = vld [vmem:[%s822_s1 + $0x18] sm:$0xff] }
   0x4   :  { %v523_v8 = vld [vmem:[%s822_s1 + $0x28] sm:$0xff]  ;;  %v441_v10 = vor.u32 %v510_v6, %v438_v7  ;;  %v522_v11 = vld [vmem:[%s822_s1 + $0x20] sm:$0xff]  ;;  %v520_v13 = vld [vmem:[%s822_s1 + $0x10] sm:$0xff] }
   0x5   :  { %v514_v14 = vld [vmem:[%s823_s0 + $0x24] sm:$0xf]  ;;  %v454_v15 = vld [vmem:[%s823_s0 + $0x28] sm:$0xf0]  ;;  %v436_v19 = vld [vmem:[%s823_s0] sm:$0xf] }
   0x6   :  { %150 = vmatpush.bf16.msra.mxu0 %v524_v2  ;;  %529 = vmatpush.bf16.msra.mxu2 %v524_v2  ;;  %v519_v16 = vld [vmem:[%s822_s1 + $0x8] sm:$0xff]  ;;  %v457_v17 = vor.u32 %v514_v14, %v454_v15  ;;  %v518_v18 = vld [vmem:[%s822_s1] sm:$0xff]  ;;  %v516_v25 = vld [vmem:[%s823_s0 + $0x34] sm:$0xf] }
   0x7   :  { %537 = vmatpush.bf16.msra.mxu3 %v526_v3  ;;  %185 = vmatpush.bf16.msra.mxu1 %v526_v3  ;;  %v511_v20 = vld [vmem:[%s823_s0 + $0x4] sm:$0xf0]  ;;  %v452_v21 = vld [vmem:[%s823_s0 + $0x20] sm:$0xf]  ;;  %v462_v26 = vld [vmem:[%s823_s0 + $0x38] sm:$0xf0] }
   0x8   :  { %v515_v22 = vld [vmem:[%s823_s0 + $0x24] sm:$0xf0]  ;;  %v437_v23 = vor.u32 %v511_v20, %v436_v19  ;;  %v465_v27 = vor.u32 %v516_v25, %v462_v26  ;;  %v444_v28 = vld [vmem:[%s823_s0 + $0x10] sm:$0xf]  ;;  %v513_v29 = vld [vmem:[%s823_s0 + $0x14] sm:$0xf0] }
   0x9   :  { %v453_v24 = vor.u32 %v515_v22, %v452_v21  ;;  %v460_v30 = vld [vmem:[%s823_s0 + $0x30] sm:$0xf]  ;;  %v517_v31 = vld [vmem:[%s823_s0 + $0x34] sm:$0xf0]  ;;  %v445_v32 = vor.u32 %v513_v29, %v444_v28 }
   0xa   :  { %151 = vmatpush.bf16.msra.mxu0 %v523_v8  ;;  %530 = vmatpush.bf16.msra.mxu2 %v523_v8  ;;  %v461_v33 = vor.u32 %v517_v31, %v460_v30 }
   0xb   :  { %507 = vmatmul.msk.bf16.vlgmr.msra.gmra.mxu3 %vm136_vm0, %v449_v9  ;;  %506 = vmatmul.msk.bf16.vlgmr.msra.gmra.mxu1 %vm136_vm0, %v441_v10 }
   0xe   :  { %152 = vmatpush.bf16.msra.mxu0 %v522_v11  ;;  %531 = vmatpush.bf16.msra.mxu2 %v522_v11 }
  0x12   :  { %153 = vmatpush.bf16.msra.mxu0 %v521_v12  ;;  %532 = vmatpush.bf16.msra.mxu2 %v521_v12 }
  0x16   :  { %154 = vmatpush.bf16.msra.mxu0 %v520_v13  ;;  %533 = vmatpush.bf16.msra.mxu2 %v520_v13 }
  0x1a   :  { %155 = vmatpush.bf16.msra.mxu0 %v519_v16  ;;  %534 = vmatpush.bf16.msra.mxu2 %v519_v16 }
  0x1b   :  { %508 = vmatmul.msk.bf16.gmra.mxu3 %vm136_vm0, %v457_v17 }
  0x1e   :  { %156 = vmatpush.bf16.msra.mxu0 %v518_v18  ;;  %535 = vmatpush.bf16.msra.mxu2 %v518_v18  ;;  %v557_v18 = vmov 32.0  }
  0x1f   :  { %539 = vrcp.f32 %v557_v18 }
  0x21   :  { %157 = vmatmul.bf16.vlgmr.msra.gmra.mxu0 %v437_v23  ;;  %167 = vmatmul.bf16.vlgmr.msra.gmra.mxu2 %v453_v24 }
  0x25   :  { %v540_v19 = vpop.eup %539 }
  0x26   :  { %v264_v20 = vmul.f32 32.0, %v540_v19  ;;  %vm268_vm1 = vweird.f32 %v540_v19 }
  0x28   :  { %v265_v21 = vsub.f32 1.0, %v264_v20 }
  0x2a   :  { %v266_v22 = vmul.f32 %v540_v19, %v265_v21 }
  0x2b   :  { %509 = vmatmul.msk.bf16.gmra.mxu3 %vm136_vm0, %v465_v27 }
  0x2c   :  { %v267_v23 = vadd.f32 %v540_v19, %v266_v22 }
  0x2e   :  { %v711_v24 = vsel %vm268_vm1, %v540_v19, %v267_v23 }
  0x31   :  { %162 = vmatmul.bf16.gmra.mxu0 %v445_v32  ;;  %172 = vmatmul.bf16.gmra.mxu2 %v461_v33 }
  0x88   :  { %v187_v36 = vpop.f32.mrf.mxu1 }
  0x8e   :  { %v192_v34 = vpop.f32.mrf.mxu3 }
  0x90   :  { %v189_v44 = vpop.f32.mrf.mxu1 }
  0x96   :  { %v194_v35 = vpop.f32.mrf.mxu3 }
  0x9e   :  { %v158_v37 = vpop.f32.mrf.mxu0  ;;  %v197_v39 = vpop.f32.mrf.mxu3 }
  0x9f   :  { %v655_v38 = vadd.f32 %v187_v36, %v158_v37 }
  0xa1   :  { %v207_v40 = vsel %vm136_vm0, %v655_v38, 0.0  ;;  %v231_v41 = vmul.f32 %v655_v38, %v655_v38 }
  0xa2   :  { %208 = vadd.xlane.f32.xlu0 %v207_v40 }
  0xa3   :  { %v239_v42 = vsel %vm136_vm0, %v231_v41, 0.0 }
  0xa4   :  { %240 = vadd.xlane.f32.xlu2 %v239_v42  ;;  %v168_v43 = vpop.f32.mrf.mxu2 }
  0xa5   :  { %v662_v45 = vadd.f32 %v197_v39, %v168_v43 }
  0xa6   :  { %v160_v46 = vpop.f32.mrf.mxu0  ;;  %v199_v50 = vpop.f32.mrf.mxu3 }
  0xa7   :  { %v664_v47 = vadd.f32 %v189_v44, %v160_v46  ;;  %v219_v49 = vsel %vm136_vm0, %v662_v45, 0.0  ;;  %v235_v51 = vmul.f32 %v662_v45, %v662_v45 }
  0xa9   :  { %v210_v48 = vsel %vm136_vm0, %v664_v47, 0.0  ;;  %v251_v56 = vsel %vm136_vm0, %v235_v51, 0.0  ;;  %v232_v62 = vmul.f32 %v664_v47, %v664_v47 }
  0xaa   :  { %211 = vadd.xlane.f32.xlu0 %v210_v48 }
  0xab   :  { %v242_v3 = vsel %vm136_vm0, %v232_v62, 0.0 }
  0xac   :  { %220 = vadd.xlane.f32.xlu2 %v219_v49  ;;  %v170_v52 = vpop.f32.mrf.mxu2 }
  0xad   :  { %v674_v55 = vadd.f32 %v199_v50, %v170_v52 }
  0xae   :  { %v163_v53 = vpop.f32.mrf.mxu0  ;;  %v202_v60 = vpop.f32.mrf.mxu3 }
  0xaf   :  { %v672_v54 = vadd.f32 %v192_v34, %v163_v53  ;;  %v222_v58 = vsel %vm136_vm0, %v674_v55, 0.0  ;;  %v236_v16 = vmul.f32 %v674_v55, %v674_v55 }
  0xb1   :  { %v213_v57 = vsel %vm136_vm0, %v672_v54, 0.0  ;;  %v233_v61 = vmul.f32 %v672_v54, %v672_v54  ;;  %v254_v17 = vsel %vm136_vm0, %v236_v16, 0.0 }
  0xb2   :  { %214 = vadd.xlane.f32.xlu1 %v213_v57  ;;  %252 = vadd.xlane.f32.xlu0 %v251_v56 }
  0xb3   :  { %v245_v2 = vsel %vm136_vm0, %v233_v61, 0.0 }
  0xb4   :  { %223 = vadd.xlane.f32.xlu2 %v222_v58  ;;  %v173_v59 = vpop.f32.mrf.mxu2 }
  0xb5   :  { %v687_v1 = vadd.f32 %v202_v60, %v173_v59 }
  0xb6   :  { %v165_v63 = vpop.f32.mrf.mxu0  ;;  %v204_v8 = vpop.f32.mrf.mxu3 }
  0xb7   :  { %v685_v0 = vadd.f32 %v194_v35, %v165_v63  ;;  %v237_v6 = vmul.f32 %v687_v1, %v687_v1  ;;  %v225_v9 = vsel %vm136_vm0, %v687_v1, 0.0 }
  0xb9   :  { %v234_v4 = vmul.f32 %v685_v0, %v685_v0  ;;  %v216_v11 = vsel %vm136_vm0, %v685_v0, 0.0  ;;  %v257_v12 = vsel %vm136_vm0, %v237_v6, 0.0 }
  0xba   :  { %246 = vadd.xlane.f32.xlu1 %v245_v2  ;;  %243 = vadd.xlane.f32.xlu0 %v242_v3 }
  0xbb   :  { %v248_v5 = vsel %vm136_vm0, %v234_v4, 0.0 }
  0xbc   :  { %249 = vadd.xlane.f32.xlu2 %v248_v5  ;;  %v175_v7 = vpop.f32.mrf.mxu2 }
  0xbd   :  { %v698_v10 = vadd.f32 %v204_v8, %v175_v7 }
  0xbf   :  { %v238_v13 = vmul.f32 %v698_v10, %v698_v10  ;;  %v228_v14 = vsel %vm136_vm0, %v698_v10, 0.0 }
  0xc1   :  { %v260_v15 = vsel %vm136_vm0, %v238_v13, 0.0 }
  0xc2   :  { %217 = vadd.xlane.f32.xlu1 %v216_v11  ;;  %226 = vadd.xlane.f32.xlu0 %v225_v9 }
  0xc4   :  { %258 = vadd.xlane.f32.xlu2 %v257_v12 }
  0xca   :  { %229 = vadd.xlane.f32.xlu1 %v228_v14  ;;  %261 = vadd.xlane.f32.xlu0 %v260_v15 }
  0xd2   :  { %255 = vadd.xlane.f32.xlu1 %v254_v17 }
 0x115   :  { %v209_v25 = vpop.xlane.xlu0 %208 }
 0x116   :  { %v270_v26 = vmul.f32 %v711_v24, %v209_v25 }
 0x117   :  { %v241_v27 = vpop.xlane.xlu2 %240 }
 0x118   :  { %v286_v28 = vmul.f32 %v270_v26, %v270_v26  ;;  %v278_v29 = vmul.f32 %v711_v24, %v241_v27  ;;  %v398_v2 = vsub.f32 %v655_v38, %v270_v26 }
 0x11a   :  { %v294_v30 = vsub.f32 %v278_v29, %v286_v28 }
 0x11c   :  { %v302_v31 = vmax.f32 %v294_v30, 0.0 }
 0x11d   :  { %v212_v32 = vpop.xlane.xlu0 %211 }
 0x11e   :  { %v310_v33 = vadd.f32 1e-05, %v302_v31  ;;  %v724_v48 = vmul.f32 %v711_v24, %v212_v32 }
 0x11f   :  { %v221_v34 = vpop.xlane.xlu2 %220 }
 0x120   :  { %541 = vrsqrt.f32 %v310_v33  ;;  %v716_v35 = vmul.f32 %v711_v24, %v221_v34  ;;  %v287_v56 = vmul.f32 %v724_v48, %v724_v48  ;;  %vm324_vm3 = vweird.f32 %v310_v33 }
 0x122   :  { %v290_v36 = vmul.f32 %v716_v35, %v716_v35 }
 0x125   :  { %v215_v37 = vpop.xlane.xlu1 %214  ;;  %v253_v39 = vpop.xlane.xlu0 %252 }
 0x126   :  { %v542_v40 = vpop.eup %541  ;;  %v282_v41 = vmul.f32 %v711_v24, %v253_v39  ;;  %v727_v49 = vmul.f32 %v711_v24, %v215_v37  ;;  %v402_v37 = vsub.f32 %v662_v45, %v716_v35 }
 0x127   :  { %v319_v42 = vmul.f32 %v542_v40, %v310_v33  ;;  %v721_v43 = vpop.xlane.xlu2 %223  ;;  %vm325_vm2 = vweird.f32 %v542_v40 }
 0x128   :  { %v298_v44 = vsub.f32 %v282_v41, %v290_v36  ;;  %v288_v59 = vmul.f32 %v727_v49, %v727_v49  ;;  %vm326_vm4 = vmor %vm324_vm3, %vm325_vm2 }
 0x129   :  { %v320_v46 = vmul.f32 %v542_v40, %v319_v42 }
 0x12a   :  { %v306_v50 = vmax.f32 %v298_v44, 0.0 }
 0x12b   :  { %v321_v51 = vmul.f32 0.5, %v320_v46 }
 0x12c   :  { %v314_v52 = vadd.f32 1e-05, %v306_v50 }
 0x12d   :  { %v322_v53 = vsub.f32 1.5, %v321_v51  ;;  %v247_v57 = vpop.xlane.xlu1 %246  ;;  %v244_v58 = vpop.xlane.xlu0 %243 }
 0x12e   :  { %543 = vrsqrt.f32 %v314_v52  ;;  %v280_v60 = vmul.f32 %v711_v24, %v247_v57  ;;  %v279_v61 = vmul.f32 %v711_v24, %v244_v58  ;;  %vm364_vm6 = vweird.f32 %v314_v52 }
 0x12f   :  { %v323_v62 = vmul.f32 %v542_v40, %v322_v53  ;;  %v250_v63 = vpop.xlane.xlu2 %249 }
 0x130   :  { %v296_v3 = vsub.f32 %v280_v60, %v288_v59  ;;  %v295_v4 = vsub.f32 %v279_v61, %v287_v56  ;;  %v281_v20 = vmul.f32 %v711_v24, %v250_v63  ;;  %v776_v60 = vmul.f32 %v711_v24, %v721_v43 }
 0x131   :  { %v327_v5 = vsel %vm326_vm4, %v542_v40, %v323_v62  ;;  %v399_v43 = vsub.f32 %v664_v47, %v724_v48 }
 0x132   :  { %v406_v6 = vmul.f32 %v398_v2, %v327_v5  ;;  %v304_v7 = vmax.f32 %v296_v3, 0.0  ;;  %v303_v8 = vmax.f32 %v295_v4, 0.0  ;;  %v400_v4 = vsub.f32 %v672_v54, %v727_v49 }
 0x134   :  { %v544_v9 = vpop.eup %543  ;;  %v414_v11 = vmax.f32 %v406_v6, 0.0  ;;  %v312_v12 = vadd.f32 1e-05, %v304_v7  ;;  %v736_v13 = vadd.f32 1e-05, %v303_v8 }
 0x135   :  { %v359_v14 = vmul.f32 %v544_v9, %v314_v52  ;;  %v218_v15 = vpop.xlane.xlu1 %217  ;;  %v227_v16 = vpop.xlane.xlu0 %226  ;;  %vm365_vm5 = vweird.f32 %v544_v9 }
 0x136   :  { %422 = vst.msk [vmem:[%s824_s2] sm:$0xff] %vm136_vm0, %v414_v11  ;;  %545 = vrsqrt.f32 %v312_v12  ;;  %v743_v38 = vmul.f32 %v711_v24, %v218_v15  ;;  %v747_v18 = vmul.f32 %v711_v24, %v227_v16  ;;  %vm366_vm7 = vmor %vm364_vm6, %vm365_vm5  ;;  %vm344_vm10 = vweird.f32 %v312_v12 }
 0x137   :  { %v360_v17 = vmul.f32 %v544_v9, %v359_v14  ;;  %547 = vrsqrt.f32 %v736_v13  ;;  %v259_v19 = vpop.xlane.xlu2 %258  ;;  %vm334_vm12 = vweird.f32 %v736_v13 }
 0x138   :  { %v289_v21 = vmul.f32 %v743_v38, %v743_v38  ;;  %v284_v22 = vmul.f32 %v711_v24, %v259_v19  ;;  %v292_v25 = vmul.f32 %v747_v18, %v747_v18 }
 0x139   :  { %v361_v23 = vmul.f32 0.5, %v360_v17 }
 0x13a   :  { %v297_v26 = vsub.f32 %v281_v20, %v289_v21  ;;  %v300_v28 = vsub.f32 %v284_v22, %v292_v25 }
 0x13b   :  { %v362_v27 = vsub.f32 1.5, %v361_v23 }
 0x13c   :  { %v546_v29 = vpop.eup %545  ;;  %v305_v30 = vmax.f32 %v297_v26, 0.0  ;;  %v308_v34 = vmax.f32 %v300_v28, 0.0 }
 0x13d   :  { %v548_v31 = vpop.eup %547  ;;  %v363_v32 = vmul.f32 %v544_v9, %v362_v27  ;;  %v339_v33 = vmul.f32 %v546_v29, %v312_v12  ;;  %v230_v36 = vpop.xlane.xlu1 %229  ;;  %vm345_vm8 = vweird.f32 %v546_v29  ;;  %v291_v12 = vmul.f32 %v776_v60, %v776_v60 }
 0x13e   :  { %v329_v39 = vmul.f32 %v548_v31, %v736_v13  ;;  %v758_v40 = vadd.f32 1e-05, %v305_v30  ;;  %v761_v41 = vmul.f32 %v711_v24, %v230_v36  ;;  %v262_v42 = vpop.xlane.xlu0 %261  ;;  %v763_v50 = vadd.f32 1e-05, %v308_v34  ;;  %vm346_vm11 = vmor %vm344_vm10, %vm345_vm8 }
 0x13f   :  { %v367_v44 = vsel %vm366_vm7, %v544_v9, %v363_v32  ;;  %v340_v46 = vmul.f32 %v546_v29, %v339_v33  ;;  %v285_v35 = vmul.f32 %v711_v24, %v262_v42  ;;  %vm335_vm9 = vweird.f32 %v548_v31 }
 0x140   :  { %v410_v51 = vmul.f32 %v402_v37, %v367_v44  ;;  %v330_v52 = vmul.f32 %v548_v31, %v329_v39  ;;  %549 = vrsqrt.f32 %v758_v40  ;;  %v293_v45 = vmul.f32 %v761_v41, %v761_v41  ;;  %vm336_vm13 = vmor %vm334_vm12, %vm335_vm9 }
 0x141   :  { %v341_v53 = vmul.f32 0.5, %v340_v46  ;;  %551 = vrsqrt.f32 %v763_v50  ;;  %vm354_vm1 = vweird.f32 %v758_v40  ;;  %v401_v27 = vsub.f32 %v685_v0, %v743_v38 }
 0x142   :  { %v418_v56 = vmax.f32 %v410_v51, 0.0  ;;  %v331_v57 = vmul.f32 0.5, %v330_v52  ;;  %v301_v59 = vsub.f32 %v285_v35, %v293_v45  ;;  %vm384_vm3 = vweird.f32 %v763_v50 }
 0x143   :  { %v342_v58 = vsub.f32 1.5, %v341_v53  ;;  %v403_v35 = vsub.f32 %v674_v55, %v776_v60 }
 0x144   :  { %426 = vst.msk [vmem:[%s824_s2 + $0x20] sm:$0xff] %vm136_vm0, %v418_v56  ;;  %v332_v61 = vsub.f32 1.5, %v331_v57  ;;  %v309_v63 = vmax.f32 %v301_v59, 0.0 }
 0x145   :  { %v343_v62 = vmul.f32 %v546_v29, %v342_v58  ;;  %v256_v2 = vpop.xlane.xlu1 %255 }
 0x146   :  { %v550_v3 = vpop.eup %549  ;;  %v333_v5 = vmul.f32 %v548_v31, %v332_v61  ;;  %v283_v6 = vmul.f32 %v711_v24, %v256_v2  ;;  %v317_v11 = vadd.f32 1e-05, %v309_v63 }
 0x147   :  { %v552_v7 = vpop.eup %551  ;;  %v347_v8 = vsel %vm346_vm11, %v546_v29, %v343_v62  ;;  %v349_v9 = vmul.f32 %v550_v3, %v758_v40  ;;  %vm355_vm14 = vweird.f32 %v550_v3 }
 0x148   :  { %v408_v14 = vmul.f32 %v400_v4, %v347_v8  ;;  %v337_v54 = vsel %vm336_vm13, %v548_v31, %v333_v5  ;;  %v379_v49 = vmul.f32 %v552_v7, %v763_v50  ;;  %553 = vrsqrt.f32 %v317_v11  ;;  %vm356_vm2 = vmor %vm354_vm1, %vm355_vm14 }
 0x149   :  { %v407_v15 = vmul.f32 %v399_v43, %v337_v54  ;;  %v350_v13 = vmul.f32 %v550_v3, %v349_v9  ;;  %v299_v17 = vsub.f32 %v283_v6, %v291_v12  ;;  %vm385_vm15 = vweird.f32 %v552_v7 }
 0x14a   :  { %v416_v24 = vmax.f32 %v408_v14, 0.0  ;;  %v380_v16 = vmul.f32 %v552_v7, %v379_v49  ;;  %v404_v31 = vsub.f32 %v687_v1, %v747_v18  ;;  %vm386_vm4 = vmor %vm384_vm3, %vm385_vm15  ;;  %vm394_vm6 = vweird.f32 %v317_v11 }
 0x14b   :  { %v415_v19 = vmax.f32 %v407_v15, 0.0  ;;  %v351_v47 = vmul.f32 0.5, %v350_v13  ;;  %v307_v20 = vmax.f32 %v299_v17, 0.0  ;;  %v405_v18 = vsub.f32 %v698_v10, %v761_v41 }
 0x14c   :  { %424 = vst.msk [vmem:[%s824_s2 + $0x10] sm:$0xff] %vm136_vm0, %v416_v24  ;;  %v381_v48 = vmul.f32 0.5, %v380_v16 }
 0x14d   :  { %423 = vst.msk [vmem:[%s824_s2 + $0x8] sm:$0xff] %vm136_vm0, %v415_v19  ;;  %v352_v21 = vsub.f32 1.5, %v351_v47  ;;  %v315_v23 = vadd.f32 1e-05, %v307_v20 }
 0x14e   :  { %v382_v22 = vsub.f32 1.5, %v381_v48  ;;  %v554_v25 = vpop.eup %553 }
 0x14f   :  { %v353_v26 = vmul.f32 %v550_v3, %v352_v21  ;;  %v389_v29 = vmul.f32 %v554_v25, %v317_v11  ;;  %555 = vrsqrt.f32 %v315_v23  ;;  %vm395_vm5 = vweird.f32 %v554_v25 }
 0x150   :  { %v383_v28 = vmul.f32 %v552_v7, %v382_v22  ;;  %vm396_vm7 = vmor %vm394_vm6, %vm395_vm5  ;;  %vm374_vm9 = vweird.f32 %v315_v23 }
 0x151   :  { %v357_v30 = vsel %vm356_vm2, %v550_v3, %v353_v26  ;;  %v390_v34 = vmul.f32 %v554_v25, %v389_v29 }
 0x152   :  { %v409_v32 = vmul.f32 %v401_v27, %v357_v30  ;;  %v387_v33 = vsel %vm386_vm4, %v552_v7, %v383_v28 }
 0x153   :  { %v412_v36 = vmul.f32 %v404_v31, %v387_v33  ;;  %v391_v39 = vmul.f32 0.5, %v390_v34 }
 0x154   :  { %v417_v37 = vmax.f32 %v409_v32, 0.0 }
 0x155   :  { %v420_v40 = vmax.f32 %v412_v36, 0.0  ;;  %v556_v42 = vpop.eup %555  ;;  %v392_v0 = vsub.f32 1.5, %v391_v39 }
 0x156   :  { %425 = vst.msk [vmem:[%s824_s2 + $0x18] sm:$0xff] %vm136_vm0, %v417_v37  ;;  %v369_v1 = vmul.f32 %v556_v42, %v315_v23  ;;  %vm375_vm8 = vweird.f32 %v556_v42 }
 0x157   :  { %428 = vst.msk [vmem:[%s824_s2 + $0x30] sm:$0xff] %vm136_vm0, %v420_v40  ;;  %v393_v38 = vmul.f32 %v554_v25, %v392_v0  ;;  %vm376_vm10 = vmor %vm374_vm9, %vm375_vm8 }
 0x158   :  { %v370_v44 = vmul.f32 %v556_v42, %v369_v1 }
 0x159   :  { %v397_v46 = vsel %vm396_vm7, %v554_v25, %v393_v38 }
 0x15a   :  { %v413_v50 = vmul.f32 %v405_v18, %v397_v46  ;;  %v371_v51 = vmul.f32 0.5, %v370_v44 }
 0x15c   :  { %v421_v52 = vmax.f32 %v413_v50, 0.0  ;;  %v372_v53 = vsub.f32 1.5, %v371_v51 }
 0x15e   :  { %429 = vst.msk [vmem:[%s824_s2 + $0x38] sm:$0xff] %vm136_vm0, %v421_v52  ;;  %v373_v45 = vmul.f32 %v556_v42, %v372_v53 }
 0x160   :  { %v377_v10 = vsel %vm376_vm10, %v556_v42, %v373_v45 }
 0x161   :  { %v411_v41 = vmul.f32 %v403_v35, %v377_v10 }
 0x163   :  { %v419_v56 = vmax.f32 %v411_v41, 0.0 }
 0x165   :  { %427 = vst.msk [vmem:[%s824_s2 + $0x28] sm:$0xff] %vm136_vm0, %v419_v56 }

</bundles_post_ra>
